<compile_context>
chip_gen: v7x
topology: tpu7x:2x2x1
jax: 0.10.0
libtpu: 0.0.40
codegen_flags: <defaults>
</compile_context>

<pallas_src>
import functools

import jax
import jax.numpy as jnp
from jax.experimental import pallas as pl
from jax.experimental.pallas import tpu as pltpu


def _round_up(x, m):
    return ((x + m - 1) // m) * m


def _sublane(dtype):
    return {4: 8, 2: 16, 1: 32}[jnp.dtype(dtype).itemsize]


# ---------------------------------------------------------------------------
# Kernel
# ---------------------------------------------------------------------------
def _deepset_kernel(x_ref,                       # (TB, TM, W)   streamed packed tile
                    w1_ref, b1_ref,              # (W, R*I1), (1, R*I1)  block-diag fc1
                    w2_ref, b2_ref,              # (R*I1, H), (1, H)     tiled fc2 + eff bias
                    w3_ref, b3_ref,              # (H, I2),   (1, I2)
                    w4_ref, b4_ref,              # (I2, Dpad),(1, Dpad)
                    o_ref,                       # (TB, 1, Dpad)
                    acc_ref,                     # (TB, R*I1) f32 scratch accumulator
                    *, tb, tile_m):
    i = pl.program_id(1)

    @pl.when(i == 0)
    def _init():
        acc_ref[...] = jnp.zeros_like(acc_ref)

    # --- hot loop: fc1 + relu on this packed tile, pooled per set -------------
    xp = x_ref[...]                                                  # (TB, TM, W)
    w = xp.shape[-1]
    x2 = xp.reshape(tb * tile_m, w).astype(jnp.float32)              # merge leading dims
    h = jnp.dot(x2, w1_ref[...], preferred_element_type=jnp.float32) + b1_ref[...]
    h = jnp.maximum(h, 0.0)                                          # (TB*TM, R*I1) f32

    if tb == 1:
        # Large-set streaming path: single set, row-sum into the (1, R*I1) acc.
        acc_ref[...] += jnp.sum(h, axis=0, keepdims=True)
    else:
        # Small-set path (one tile per set): unrolled per-set sublane reduce.
        for b in range(tb):
            seg = h[b * tile_m:(b + 1) * tile_m, :]                  # tile-aligned slice
            acc_ref[pl.ds(b, 1), :] += jnp.sum(seg, axis=0, keepdims=True)

    # --- finalize: reassociated phi.fc2 + rho epilogue, once per batch block --
    @pl.when(i == pl.num_programs(1) - 1)
    def _finalize():
        s = acc_ref[...]                                             # (TB, R*I1)
        # b2_ref already holds  N*b2 - (#pad rows)*relu(b1)@W2^T  (exact correction).
        phi = jnp.dot(s, w2_ref[...], preferred_element_type=jnp.float32) + b2_ref[...]
        g = jnp.maximum(
            jnp.dot(phi, w3_ref[...], preferred_element_type=jnp.float32) + b3_ref[...],
            0.0)                                                     # (TB, I2)
        out = jnp.dot(g, w4_ref[...], preferred_element_type=jnp.float32) + b4_ref[...]
        o_ref[...] = out.reshape(o_ref.shape).astype(o_ref.dtype)


# ---------------------------------------------------------------------------
# Tiling plan
# ---------------------------------------------------------------------------
def _plan_tiles(B, N, D_in, compute_dtype, x_budget_bytes):
    itemsize = jnp.dtype(compute_dtype).itemsize
    sub = _sublane(compute_dtype)
    R = max(1, 128 // D_in) if D_in < 128 else 1        # lane-packing factor
    W = R * D_in                                        # packed row width
    W_pad = _round_up(W, 128)                           # VMEM lane-padded width
    M = -(-N // R)                                      # packed rows per set
    M0 = _round_up(max(M, sub), sub)
    bytes_per_set = M0 * W_pad * itemsize

    if bytes_per_set > x_budget_bytes:
        # Large sets: stream one set at a time in MiB-scale row tiles.
        tb = 1
        rows = max(sub, (x_budget_bytes // (W_pad * itemsize)) // sub * sub)
        tile_m = min(rows, M0)
        m_final = _round_up(M0, tile_m)
    else:
        # Small sets: whole packed set is one tile; block several sets per grid
        # step to amortize per-step overhead (unrolled per-set reduce -> cap 32).
        tile_m = M0
        m_final = M0
        tb = int(max(1, min(B, 32, x_budget_bytes // bytes_per_set)))
    return R, W, tb, tile_m, m_final


# ---------------------------------------------------------------------------
# Wrapper
# ---------------------------------------------------------------------------
@functools.partial(jax.jit, static_argnames=("compute_dtype", "x_budget_bytes"))
def deepset_forward(x, params, *, compute_dtype=jnp.bfloat16,
                    x_budget_bytes=4 * 1024 * 1024):
    """DeepSetModel forward.

    x: (N, D_in) -> (D_out,)   or   (B, N, D_in) -> (B, D_out)
    `compute_dtype` is the HBM dtype of the streamed x (weights & accumulation are
    f32); bf16 default halves HBM bytes on the bandwidth-bound path.
    """
    (w1, b1), (w2, b2), (w3, b3), (w4, b4) = params

    squeeze = (x.ndim == 2)
    if squeeze:
        x = x[None]
    B, N, D_in = x.shape
    I1 = w1.shape[0]                # phi hidden (10)
    H = w2.shape[0]                 # phi output / rho input
    I2 = w3.shape[0]                # rho hidden (10)
    D_out = w4.shape[0]
    D_pad = _round_up(max(D_out, 128), 128)             # lane-dense output

    R, W, TB, tile_m, m_final = _plan_tiles(B, N, D_in, compute_dtype, x_budget_bytes)
    B_pad = _round_up(B, TB)
    n_tiles = m_final // tile_m
    pad_rows = m_final * R - N                          # zero row-slots added per set

    # Pack x: (B, N, D_in) -> (B_pad, m_final, R*D_in), zero padding on set & batch.
    x_p = x.astype(compute_dtype)
    x_p = jnp.pad(x_p, ((0, B_pad - B), (0, pad_rows), (0, 0)))
    x_p = x_p.reshape(B_pad, m_final, W)

    f32 = jnp.float32
    w1t = w1.T.astype(f32)                                           # (D_in, I1)
    w1bd = jnp.kron(jnp.eye(R, dtype=f32), w1t) if R > 1 else w1t    # (W, R*I1)
    b1t = jnp.tile(b1.astype(f32), R)[None, :]                       # (1, R*I1)
    w2t = jnp.tile(w2.T.astype(f32), (R, 1))                         # (R*I1, H)
    # Padded zero rows each contribute relu(b1) @ W2^T; fold the exact correction
    # and the N*b2 term of the reassociated pooling into one effective bias.
    b2eff = (float(N) * b2.astype(f32)
             - float(pad_rows) * (jnp.maximum(b1.astype(f32), 0.0)
                                  @ w2.T.astype(f32)))[None, :]      # (1, H)
    w3t = w3.T.astype(f32)                                           # (H, I2)
    b3r = b3.astype(f32)[None, :]                                    # (1, I2)
    w4t = jnp.zeros((I2, D_pad), f32).at[:, :D_out].set(w4.T.astype(f32))
    b4r = jnp.zeros((1, D_pad), f32).at[:, :D_out].set(b4.astype(f32))

    kernel = functools.partial(_deepset_kernel, tb=TB, tile_m=tile_m)
    const2 = lambda b, i: (0, 0)                                     # resident operands

    out = pl.pallas_call(
        kernel,
        out_shape=jax.ShapeDtypeStruct((B_pad, 1, D_pad), f32),
        grid_spec=pltpu.PrefetchScalarGridSpec(
            num_scalar_prefetch=0,
            grid=(B_pad // TB, n_tiles),
            in_specs=[
                pl.BlockSpec((TB, tile_m, W), lambda b, i: (b, i, 0)),   # x stream
                pl.BlockSpec((W, R * I1), const2), pl.BlockSpec((1, R * I1), const2),
                pl.BlockSpec((R * I1, H), const2), pl.BlockSpec((1, H), const2),
                pl.BlockSpec((H, I2), const2),     pl.BlockSpec((1, I2), const2),
                pl.BlockSpec((I2, D_pad), const2), pl.BlockSpec((1, D_pad), const2),
            ],
            out_specs=pl.BlockSpec((TB, 1, D_pad), lambda b, i: (b, 0, 0)),
            scratch_shapes=[pltpu.VMEM((TB, R * I1), f32)],
        ),
        compiler_params=pltpu.CompilerParams(
            dimension_semantics=("parallel", "arbitrary"),
            # 2 x ~4 MiB x-buffers + tiny resident weights: safe on every
            # generation (incl. v7x's 64 MiB physical / 32 MiB scoped VMEM).
            vmem_limit_bytes=32 * 1024 * 1024,
        ),
    )(x_p, w1bd, b1t, w2t, b2eff, w3t, b3r, w4t, b4r)

    out = out.reshape(B_pad, D_pad)[:B, :D_out]
    return out[0] if squeeze else out


# ---------------------------------------------------------------------------
# Init + pure-JAX reference (PyTorch-equivalent semantics)
# ---------------------------------------------------------------------------
def init_params(key, input_size, output_size, hidden_size, inner=10):
    """phi = SmallPhi(input_size, hidden_size, 10); rho = SmallPhi(hidden_size, output_size, 10)."""
    def linear(key, fan_in, fan_out):
        kw, kb = jax.random.split(key)
        bound = 1.0 / jnp.sqrt(fan_in)
        w = jax.random.uniform(kw, (fan_out, fan_in), jnp.float32, -bound, bound)
        b = jax.random.uniform(kb, (fan_out,), jnp.float32, -bound, bound)
        return w, b

    k1, k2, k3, k4 = jax.random.split(key, 4)
    return (
        linear(k1, input_size, inner),        # phi.fc1
        linear(k2, inner, hidden_size),       # phi.fc2
        linear(k3, hidden_size, inner),       # rho.fc1
        linear(k4, inner, output_size),       # rho.fc2
    )


def reference_forward(x, params):
    (w1, b1), (w2, b2), (w3, b3), (w4, b4) = params
    h = jnp.maximum(x @ w1.T + b1, 0.0)
    phi = h @ w2.T + b2
    s = jnp.sum(phi, axis=0)
    g = jnp.maximum(s @ w3.T + b3, 0.0)
    return g @ w4.T + b4


# ---------------------------------------------------------------------------
if __name__ == "__main__":
    INPUT_SIZE = 32
    HIDDEN_SIZE = 16
    OUTPUT_SIZE = 4

    key = jax.random.PRNGKey(0)
    kx1, kx2, kx3, kp = jax.random.split(key, 4)
    params = init_params(kp, INPUT_SIZE, OUTPUT_SIZE, HIDDEN_SIZE)

    # 1) Single set, exact f32 stream (tight check of kernel math / lane packing).
    x = jax.random.normal(kx1, (8, INPUT_SIZE), jnp.float32)
    out = jax.block_until_ready(deepset_forward(x, params, compute_dtype=jnp.float32))
    ref = reference_forward(x, params)
    assert out.shape == (OUTPUT_SIZE,), out.shape
    assert jnp.allclose(out, ref, atol=1e-4, rtol=1e-4), (out, ref)

    # 2) Batched sets, non-aligned N, default bf16 x-stream (batch-blocked path).
    xb = jax.random.normal(kx2, (3, 11, INPUT_SIZE), jnp.float32)
    outb = jax.block_until_ready(deepset_forward(xb, params))
    refb = jnp.stack([reference_forward(xb[i], params) for i in range(xb.shape[0])])
    assert outb.shape == (3, OUTPUT_SIZE), outb.shape
    assert jnp.allclose(outb, refb, atol=3e-2, rtol=3e-2), (outb, refb)

    # 3) Larger set with an artificially tiny tile budget to exercise the
    #    multi-tile streaming/accumulation path (f32, tight check).
    xl = jax.random.normal(kx3, (200, INPUT_SIZE), jnp.float32)
    outl = jax.block_until_ready(
        deepset_forward(xl, params, compute_dtype=jnp.float32, x_budget_bytes=8192))
    refl = reference_forward(xl, params)
    assert jnp.allclose(outl, refl, atol=5e-4, rtol=5e-4), (outl, refl)

    print("KERNEL_OK")
</pallas_src>

<mosaic_0001>
module attributes {stable_mosaic.version = 11 : i64} {
  func.func @_deepset_kernel(%arg0: i32, %arg1: i32, %arg2: memref<1x8x128xf32, #tpu.memory_space<vmem>>, %arg3: memref<128x40xf32, #tpu.memory_space<vmem>>, %arg4: memref<1x40xf32, #tpu.memory_space<vmem>>, %arg5: memref<40x16xf32, #tpu.memory_space<vmem>>, %arg6: memref<1x16xf32, #tpu.memory_space<vmem>>, %arg7: memref<16x10xf32, #tpu.memory_space<vmem>>, %arg8: memref<1x10xf32, #tpu.memory_space<vmem>>, %arg9: memref<10x128xf32, #tpu.memory_space<vmem>>, %arg10: memref<1x128xf32, #tpu.memory_space<vmem>>, %arg11: memref<1x1x128xf32, #tpu.memory_space<vmem>>, %arg12: memref<1x40xf32, #tpu.memory_space<vmem>>) attributes {dimension_semantics = [#tpu.dimension_semantics<parallel>, #tpu.dimension_semantics<arbitrary>], iteration_bounds = array<i64: 1, 1>, scalar_prefetch = 0 : i64, scratch_operands = 1 : i64, tpu.core_type = #tpu.core_type<tc>, window_params = [{transform_indices = @transform_0, window_bounds = array<i64: 1, 8, 128>}, {pipeline_mode = #tpu.pipeline_mode<synchronous>, transform_indices = @transform_1, window_bounds = array<i64: 128, 40>}, {pipeline_mode = #tpu.pipeline_mode<synchronous>, transform_indices = @transform_2, window_bounds = array<i64: 1, 40>}, {pipeline_mode = #tpu.pipeline_mode<synchronous>, transform_indices = @transform_3, window_bounds = array<i64: 40, 16>}, {pipeline_mode = #tpu.pipeline_mode<synchronous>, transform_indices = @transform_4, window_bounds = array<i64: 1, 16>}, {pipeline_mode = #tpu.pipeline_mode<synchronous>, transform_indices = @transform_5, window_bounds = array<i64: 16, 10>}, {pipeline_mode = #tpu.pipeline_mode<synchronous>, transform_indices = @transform_6, window_bounds = array<i64: 1, 10>}, {pipeline_mode = #tpu.pipeline_mode<synchronous>, transform_indices = @transform_7, window_bounds = array<i64: 10, 128>}, {pipeline_mode = #tpu.pipeline_mode<synchronous>, transform_indices = @transform_8, window_bounds = array<i64: 1, 128>}, {transform_indices = @transform_9, window_bounds = array<i64: 1, 1, 128>}]} {
    %c0_i32 = arith.constant 0 : i32
    %0 = arith.cmpi eq, %arg1, %c0_i32 : i32
    %1 = arith.extui %0 : i1 to i32
    %c0_i32_0 = arith.constant 0 : i32
    %2 = arith.cmpi ne, %1, %c0_i32_0 : i32
    scf.if %2 {
      %cst_15 = arith.constant 0.000000e+00 : f32
      %20 = vector.broadcast %cst_15 : f32 to vector<1x40xf32>
      %c0_16 = arith.constant 0 : index
      %c0_17 = arith.constant 0 : index
      %21 = vector.load %arg12[%c0_16, %c0_17] : memref<1x40xf32, #tpu.memory_space<vmem>>, vector<1x40xf32>
      tpu.vector_store %arg12[%c0_16, %c0_17], %20 {strides = array<i32>} : memref<1x40xf32, #tpu.memory_space<vmem>>, vector<1x40xf32>,
    } else {
    }
    %c0 = arith.constant 0 : index
    %c0_1 = arith.constant 0 : index
    %c0_2 = arith.constant 0 : index
    %3 = vector.load %arg2[%c0, %c0_1, %c0_2] : memref<1x8x128xf32, #tpu.memory_space<vmem>>, vector<1x8x128xf32>
    %4 = vector.shape_cast %3 : vector<1x8x128xf32> to vector<8x128xf32>
    %c0_3 = arith.constant 0 : index
    %c0_4 = arith.constant 0 : index
    %5 = vector.load %arg3[%c0_3, %c0_4] : memref<128x40xf32, #tpu.memory_space<vmem>>, vector<128x40xf32>
    %cst = arith.constant dense<0.000000e+00> : vector<8x40xf32>
    %6 = tpu.matmul %4, %5, %cst {dimension_numbers = #tpu.dot_dimension_numbers<[1], [0], [0], [1], [0, 0, 1, 1], [], []>} : vector<8x128xf32>, vector<128x40xf32>, vector<8x40xf32> -> vector<8x40xf32>
    %c0_5 = arith.constant 0 : index
    %c0_6 = arith.constant 0 : index
    %7 = vector.load %arg4[%c0_5, %c0_6] : memref<1x40xf32, #tpu.memory_space<vmem>>, vector<1x40xf32>
    %8 = vector.broadcast %7 : vector<1x40xf32> to vector<8x40xf32>
    %9 = arith.addf %6, %8 : vector<8x40xf32>
    %cst_7 = arith.constant 0.000000e+00 : f32
    %10 = vector.broadcast %cst_7 : f32 to vector<8x40xf32>
    %11 = arith.maximumf %9, %10 : vector<8x40xf32>
    %c0_8 = arith.constant 0 : index
    %c0_9 = arith.constant 0 : index
    %12 = vector.load %arg12[%c0_8, %c0_9] : memref<1x40xf32, #tpu.memory_space<vmem>>, vector<1x40xf32>
    %cst_10 = arith.constant dense<0.000000e+00> : vector<40xf32>
    %13 = vector.multi_reduction <add>, %11, %cst_10 [0] : vector<8x40xf32> to vector<40xf32>
    %14 = vector.shape_cast %13 : vector<40xf32> to vector<1x40xf32>
    %15 = arith.addf %12, %14 : vector<1x40xf32>
    %c0_11 = arith.constant 0 : index
    %c0_12 = arith.constant 0 : index
    %16 = vector.load %arg12[%c0_11, %c0_12] : memref<1x40xf32, #tpu.memory_space<vmem>>, vector<1x40xf32>
    tpu.vector_store %arg12[%c0_11, %c0_12], %15 {strides = array<i32>} : memref<1x40xf32, #tpu.memory_space<vmem>>, vector<1x40xf32>,
    %c0_i32_13 = arith.constant 0 : i32
    %17 = arith.cmpi eq, %arg1, %c0_i32_13 : i32
    %18 = arith.extui %17 : i1 to i32
    %c0_i32_14 = arith.constant 0 : i32
    %19 = arith.cmpi ne, %18, %c0_i32_14 : i32
    scf.if %19 {
      %c0_15 = arith.constant 0 : index
      %c0_16 = arith.constant 0 : index
      %20 = vector.load %arg12[%c0_15, %c0_16] : memref<1x40xf32, #tpu.memory_space<vmem>>, vector<1x40xf32>
      %c0_17 = arith.constant 0 : index
      %c0_18 = arith.constant 0 : index
      %21 = vector.load %arg5[%c0_17, %c0_18] : memref<40x16xf32, #tpu.memory_space<vmem>>, vector<40x16xf32>
      %cst_19 = arith.constant dense<0.000000e+00> : vector<1x16xf32>
      %22 = tpu.matmul %20, %21, %cst_19 {dimension_numbers = #tpu.dot_dimension_numbers<[1], [0], [0], [1], [0, 0, 1, 1], [], []>} : vector<1x40xf32>, vector<40x16xf32>, vector<1x16xf32> -> vector<1x16xf32>
      %c0_20 = arith.constant 0 : index
      %c0_21 = arith.constant 0 : index
      %23 = vector.load %arg6[%c0_20, %c0_21] : memref<1x16xf32, #tpu.memory_space<vmem>>, vector<1x16xf32>
      %24 = arith.addf %22, %23 : vector<1x16xf32>
      %c0_22 = arith.constant 0 : index
      %c0_23 = arith.constant 0 : index
      %25 = vector.load %arg7[%c0_22, %c0_23] : memref<16x10xf32, #tpu.memory_space<vmem>>, vector<16x10xf32>
      %cst_24 = arith.constant dense<0.000000e+00> : vector<1x10xf32>
      %26 = tpu.matmul %24, %25, %cst_24 {dimension_numbers = #tpu.dot_dimension_numbers<[1], [0], [0], [1], [0, 0, 1, 1], [], []>} : vector<1x16xf32>, vector<16x10xf32>, vector<1x10xf32> -> vector<1x10xf32>
      %c0_25 = arith.constant 0 : index
      %c0_26 = arith.constant 0 : index
      %27 = vector.load %arg8[%c0_25, %c0_26] : memref<1x10xf32, #tpu.memory_space<vmem>>, vector<1x10xf32>
      %28 = arith.addf %26, %27 : vector<1x10xf32>
      %cst_27 = arith.constant 0.000000e+00 : f32
      %29 = vector.broadcast %cst_27 : f32 to vector<1x10xf32>
      %30 = arith.maximumf %28, %29 : vector<1x10xf32>
      %c0_28 = arith.constant 0 : index
      %c0_29 = arith.constant 0 : index
      %31 = vector.load %arg9[%c0_28, %c0_29] : memref<10x128xf32, #tpu.memory_space<vmem>>, vector<10x128xf32>
      %cst_30 = arith.constant dense<0.000000e+00> : vector<1x128xf32>
      %32 = tpu.matmul %30, %31, %cst_30 {dimension_numbers = #tpu.dot_dimension_numbers<[1], [0], [0], [1], [0, 0, 1, 1], [], []>} : vector<1x10xf32>, vector<10x128xf32>, vector<1x128xf32> -> vector<1x128xf32>
      %c0_31 = arith.constant 0 : index
      %c0_32 = arith.constant 0 : index
      %33 = vector.load %arg10[%c0_31, %c0_32] : memref<1x128xf32, #tpu.memory_space<vmem>>, vector<1x128xf32>
      %34 = arith.addf %32, %33 : vector<1x128xf32>
      %35 = vector.shape_cast %34 : vector<1x128xf32> to vector<1x1x128xf32>
      %c0_33 = arith.constant 0 : index
      %c0_34 = arith.constant 0 : index
      %c0_35 = arith.constant 0 : index
      %36 = vector.load %arg11[%c0_33, %c0_34, %c0_35] : memref<1x1x128xf32, #tpu.memory_space<vmem>>, vector<1x1x128xf32>
      tpu.vector_store %arg11[%c0_33, %c0_34, %c0_35], %35 {strides = array<i32>} : memref<1x1x128xf32, #tpu.memory_space<vmem>>, vector<1x1x128xf32>,
    } else {
    }
    return
  }
  func.func @transform_0(%arg0: i32, %arg1: i32) -> (i32, i32, i32) {
    %c0_i32 = arith.constant 0 : i32
    %c0_i32_0 = arith.constant 0 : i32
    return %arg0, %arg1, %c0_i32 : i32, i32, i32
  }
  func.func @transform_1(%arg0: i32, %arg1: i32) -> (i32, i32) {
    %c0_i32 = arith.constant 0 : i32
    %c0_i32_0 = arith.constant 0 : i32
    %c0_i32_1 = arith.constant 0 : i32
    return %c0_i32, %c0_i32_0 : i32, i32
  }
  func.func @transform_2(%arg0: i32, %arg1: i32) -> (i32, i32) {
    %c0_i32 = arith.constant 0 : i32
    %c0_i32_0 = arith.constant 0 : i32
    %c0_i32_1 = arith.constant 0 : i32
    return %c0_i32, %c0_i32_0 : i32, i32
  }
  func.func @transform_3(%arg0: i32, %arg1: i32) -> (i32, i32) {
    %c0_i32 = arith.constant 0 : i32
    %c0_i32_0 = arith.constant 0 : i32
    %c0_i32_1 = arith.constant 0 : i32
    return %c0_i32, %c0_i32_0 : i32, i32
  }
  func.func @transform_4(%arg0: i32, %arg1: i32) -> (i32, i32) {
    %c0_i32 = arith.constant 0 : i32
    %c0_i32_0 = arith.constant 0 : i32
    %c0_i32_1 = arith.constant 0 : i32
    return %c0_i32, %c0_i32_0 : i32, i32
  }
  func.func @transform_5(%arg0: i32, %arg1: i32) -> (i32, i32) {
    %c0_i32 = arith.constant 0 : i32
    %c0_i32_0 = arith.constant 0 : i32
    %c0_i32_1 = arith.constant 0 : i32
    return %c0_i32, %c0_i32_0 : i32, i32
  }
  func.func @transform_6(%arg0: i32, %arg1: i32) -> (i32, i32) {
    %c0_i32 = arith.constant 0 : i32
    %c0_i32_0 = arith.constant 0 : i32
    %c0_i32_1 = arith.constant 0 : i32
    return %c0_i32, %c0_i32_0 : i32, i32
  }
  func.func @transform_7(%arg0: i32, %arg1: i32) -> (i32, i32) {
    %c0_i32 = arith.constant 0 : i32
    %c0_i32_0 = arith.constant 0 : i32
    %c0_i32_1 = arith.constant 0 : i32
    return %c0_i32, %c0_i32_0 : i32, i32
  }
  func.func @transform_8(%arg0: i32, %arg1: i32) -> (i32, i32) {
    %c0_i32 = arith.constant 0 : i32
    %c0_i32_0 = arith.constant 0 : i32
    %c0_i32_1 = arith.constant 0 : i32
    return %c0_i32, %c0_i32_0 : i32, i32
  }
  func.func @transform_9(%arg0: i32, %arg1: i32) -> (i32, i32, i32) {
    %c0_i32 = arith.constant 0 : i32
    %c0_i32_0 = arith.constant 0 : i32
    %c0_i32_1 = arith.constant 0 : i32
    return %arg0, %c0_i32, %c0_i32_0 : i32, i32, i32
  }
}

</mosaic_0001>

<bundles_post_ra>
// kernel: tile.19
= control target key start
LH: loop header
LB: loop body
LE: loop exit
PB: predicated region body
PF: predicated region fallthrough
CT: control target
= control target key end

     0   :  { %vm82_vm0 = vcmask 1047556   ;;  %vm84_vm1 = vcmask 80896   ;;  %s195_s9 = smov 30   ;;  %s196_s14 = smov 10   ;;  %vm103_vm2 = vcmask 326896   ;;  %vm124_vm3 = vcmask 244896   ;;  %s289_s0 = inlined_call_operand.vmem [shape: f32[4,10,16], index: 0, kind: input, shape index: {}]   ;;  %s290_s1 = inlined_call_operand.vmem [shape: f32[40,16], index: 1, kind: output, shape index: {}]  }
   0x1   :  { %v180_v0 = vld [vmem:[%s289_s0 + $0x1c] sm:$0xf]  ;;  %v181_v1 = vld [vmem:[%s289_s0 + $0x18] sm:$0xf]  ;;  %v182_v2 = vld [vmem:[%s289_s0 + $0x14] sm:$0xf] }
   0x2   :  { %48 = vst [vmem:[#allocation0 + $0x38] sm:$0xf] %v180_v0  ;;  %53 = vst [vmem:[#allocation0 + $0x30] sm:$0xf] %v181_v1  ;;  %v183_v3 = vld [vmem:[%s289_s0 + $0x10] sm:$0xf] }
   0x3   :  { %58 = vst [vmem:[#allocation0 + $0x28] sm:$0xf] %v182_v2  ;;  %v184_v4 = vld [vmem:[%s289_s0 + $0xc] sm:$0xf]  ;;  %v185_v5 = vld [vmem:[%s289_s0 + $0x8] sm:$0xf] }
   0x4   :  { %63 = vst [vmem:[#allocation0 + $0x20] sm:$0xf] %v183_v3  ;;  %68 = vst [vmem:[#allocation0 + $0x18] sm:$0xf] %v184_v4  ;;  %v186_v6 = vld [vmem:[%s289_s0 + $0x4] sm:$0xf] }
   0x5   :  { %73 = vst [vmem:[#allocation0 + $0x10] sm:$0xf] %v185_v5  ;;  %v78_v7 = vld [vmem:[%s289_s0] sm:$0xf]  ;;  %77 = vst [vmem:[#allocation0 + $0x8] sm:$0xf] %v186_v6 }
   0x6   :  { %79 = vst [vmem:[#allocation0] sm:$0xf] %v78_v7  ;;  %v172_v8 = vld [vmem:[%s289_s0 + $0x3c] sm:$0xf]  ;;  %v173_v9 = vld [vmem:[%s289_s0 + $0x38] sm:$0xf] }
   0x7   :  { %8 = vst [vmem:[#allocation0 + $0x78] sm:$0xf] %v172_v8  ;;  %13 = vst [vmem:[#allocation0 + $0x70] sm:$0xf] %v173_v9  ;;  %v174_v10 = vld [vmem:[%s289_s0 + $0x34] sm:$0xf] }
   0x8   :  { %v175_v11 = vld [vmem:[%s289_s0 + $0x30] sm:$0xf]  ;;  %v176_v12 = vld [vmem:[%s289_s0 + $0x2c] sm:$0xf]  ;;  %18 = vst [vmem:[#allocation0 + $0x68] sm:$0xf] %v174_v10 }
   0x9   :  { %23 = vst [vmem:[#allocation0 + $0x60] sm:$0xf] %v175_v11  ;;  %28 = vst [vmem:[#allocation0 + $0x58] sm:$0xf] %v176_v12  ;;  %v177_v13 = vld [vmem:[%s289_s0 + $0x28] sm:$0xf] }
   0xa   :  { %v178_v14 = vld [vmem:[%s289_s0 + $0x24] sm:$0xf]  ;;  %v179_v15 = vld [vmem:[%s289_s0 + $0x20] sm:$0xf]  ;;  %33 = vst [vmem:[#allocation0 + $0x50] sm:$0xf] %v177_v13 }
   0xb   :  { %38 = vst [vmem:[#allocation0 + $0x48] sm:$0xf] %v178_v14  ;;  %43 = vst [vmem:[#allocation0 + $0x40] sm:$0xf] %v179_v15  ;;  %s194_s0 = smov 20   ;;  %vm145_vm4 = vcmask 162896  }
   0xc   :  { %v119_v16 = vld [vmem:[#allocation0 + $0x2] ss:$8 sm:$0xf0]   ;;  %v98_v17 = vld [vmem:[#allocation0 + $0x3] ss:$8 sm:$0xf0]  }
   0xd   :  { %v117_v18 = vld [vmem:[#allocation0 + $0x2] ss:$8 sm:$0xf]   ;;  %v96_v19 = vld [vmem:[#allocation0 + $0x3] ss:$8 sm:$0xf]  }
   0xe   :  { %v121_v20 = vsel %vm82_vm0, %v119_v16, %v117_v18  ;;  %v100_v21 = vsel %vm82_vm0, %v98_v17, %v96_v19  ;;  %v138_v24 = vld [vmem:[#allocation0 + $0x1] ss:$8 sm:$0xf]   ;;  %v80_v32 = vld [vmem:[#allocation0] ss:$8 sm:$0xf]  }
   0xf   :  { %122 = vrot.lane.b32.xlu1 %v121_v20, %s194_s0  ;;  %101 = vrot.lane.b32.xlu0 %v100_v21, %s195_s9  ;;  %v140_v25 = vld [vmem:[#allocation0 + $0x1] ss:$8 sm:$0xf0]   ;;  %v81_v33 = vld [vmem:[#allocation0] ss:$8 sm:$0xf0]  }
  0x10   :  { %v129_v22 = vld [vmem:[#allocation0 + $0x42] ss:$8 sm:$0xf0]   ;;  %v108_v23 = vld [vmem:[#allocation0 + $0x43] ss:$8 sm:$0xf0]   ;;  %v83_v34 = vsel %vm82_vm0, %v81_v33, %v80_v32  ;;  %v142_v38 = vsel %vm82_vm0, %v140_v25, %v138_v24 }
  0x11   :  { %v150_v31 = vld [vmem:[#allocation0 + $0x41] ss:$8 sm:$0xf0]   ;;  %v89_v36 = vld [vmem:[#allocation0 + $0x40] ss:$8 sm:$0xf0]  }
  0x12   :  { %v127_v26 = vld [vmem:[#allocation0 + $0x42] ss:$8 sm:$0xf]   ;;  %v106_v27 = vld [vmem:[#allocation0 + $0x43] ss:$8 sm:$0xf]  }
  0x13   :  { %v131_v28 = vsel %vm82_vm0, %v129_v22, %v127_v26  ;;  %v110_v29 = vsel %vm82_vm0, %v108_v23, %v106_v27  ;;  %v148_v30 = vld [vmem:[#allocation0 + $0x41] ss:$8 sm:$0xf]   ;;  %v87_v35 = vld [vmem:[#allocation0 + $0x40] ss:$8 sm:$0xf]  }
  0x14   :  { %132 = vrot.lane.b32.xlu1 %v131_v28, %s194_s0  ;;  %111 = vrot.lane.b32.xlu0 %v110_v29, %s195_s9  ;;  %v152_v37 = vsel %vm82_vm0, %v150_v31, %v148_v30  ;;  %85 = vst.msk [vmem:[%s290_s1] sm:$0xff] %vm84_vm1, %v83_v34   ;;  %v91_v39 = vsel %vm82_vm0, %v89_v36, %v87_v35 }
  0x15   :  { %187 = vst.msk [vmem:[%s290_s1 + $0x8] sm:$0xff] %vm84_vm1, %v91_v39  }
  0x18   :  { %153 = vrot.lane.b32.xlu1 %v152_v37, %s196_s14  ;;  %143 = vrot.lane.b32.xlu0 %v142_v38, %s196_s14 }
  0x81   :  { %v123_v40 = vpop.permute.xlu1 %122   ;;  %v102_v41 = vpop.permute.xlu0 %101  }
  0x82   :  { %104 = vst.msk [vmem:[%s290_s1] sm:$0xff] %vm103_vm2, %v102_v41  }
  0x83   :  { %125 = vst.msk [vmem:[%s290_s1] sm:$0xff] %vm124_vm3, %v123_v40  }
  0x86   :  { %v133_v42 = vpop.permute.xlu1 %132   ;;  %v112_v43 = vpop.permute.xlu0 %111  }
  0x87   :  { %188 = vst.msk [vmem:[%s290_s1 + $0x8] sm:$0xff] %vm103_vm2, %v112_v43  }
  0x88   :  { %189 = vst.msk [vmem:[%s290_s1 + $0x8] sm:$0xff] %vm124_vm3, %v133_v42  }
  0x8a   :  { %v154_v44 = vpop.permute.xlu1 %153   ;;  %v144_v45 = vpop.permute.xlu0 %143  }
  0x8b   :  { %190 = vst.msk [vmem:[%s290_s1 + $0x8] sm:$0xff] %vm145_vm4, %v154_v44   ;;  %146 = vst.msk [vmem:[%s290_s1] sm:$0xff] %vm145_vm4, %v144_v45  }

// kernel: tile.13
= control target key start
LH: loop header
LB: loop body
LE: loop exit
PB: predicated region body
PF: predicated region fallthrough
CT: control target
= control target key end

     0   :  { %s22_s0 = inlined_call_operand.vmem [shape: f32[10], index: 0, kind: input, shape index: {}]   ;;  %s23_s1 = inlined_call_operand.vmem [shape: f32[4,10], index: 1, kind: output, shape index: {}]  }
   0x1   :  { %v4_v0 = vld [vmem:[%s22_s0] ss:$0 sm:$0xff] }
   0x2   :  { %5 = vst [vmem:[%s23_s1] sm:$0xf] %v4_v0 }

// kernel: tile.14
= control target key start
LH: loop header
LB: loop body
LE: loop exit
PB: predicated region body
PF: predicated region fallthrough
CT: control target
= control target key end

     0   :  { %vm7_vm0 = vcmask 80896   ;;  %s37_s8 = smov 10   ;;  %s38_s9 = smov 20   ;;  %vm13_vm1 = vcmask 326896   ;;  %vm19_vm2 = vcmask 244896   ;;  %vm25_vm3 = vcmask 162896   ;;  %s55_s0 = inlined_call_operand.vmem [shape: f32[4,10], index: 0, kind: input, shape index: {}]   ;;  %s56_s1 = inlined_call_operand.vmem [shape: f32[1,40], index: 1, kind: output, shape index: {}]  }
   0x1   :  { %v4_v0 = vld [vmem:[%s55_s0] sm:$0xf]  ;;  %s36_s0 = smov 30  }
   0x2   :  { %5 = vst [vmem:[#allocation1] sm:$0xf] %v4_v0 }
   0x9   :  { %v10_v1 = vld [vmem:[#allocation1 + $0x3] sm:$0x1]   ;;  %v22_v2 = vld [vmem:[#allocation1 + $0x1] sm:$0x1]   ;;  %v6_v3 = vld [vmem:[#allocation1] sm:$0x1]  }
   0xa   :  { %11 = vrot.lane.b32.xlu0 %v10_v1, %s36_s0  ;;  %23 = vrot.lane.b32.xlu1 %v22_v2, %s37_s8  ;;  %v16_v4 = vld [vmem:[#allocation1 + $0x2] sm:$0x1]   ;;  %8 = vst.msk [vmem:[#allocation0] sm:$0x1] %vm7_vm0, %v6_v3  }
   0xe   :  { %17 = vrot.lane.b32.xlu0 %v16_v4, %s38_s9 }
  0x7c   :  { %v12_v5 = vpop.permute.xlu0 %11   ;;  %v24_v6 = vpop.permute.xlu1 %23  }
  0x7d   :  { %14 = vst.msk [vmem:[#allocation0] sm:$0x1] %vm13_vm1, %v12_v5  }
  0x80   :  { %v18_v7 = vpop.permute.xlu0 %17  }
  0x81   :  { %20 = vst.msk [vmem:[#allocation0] sm:$0x1] %vm19_vm2, %v18_v7  }
  0x82   :  { %26 = vst.msk [vmem:[#allocation0] sm:$0x1] %vm25_vm3, %v24_v6  }
  0x89   :  { %v30_v8 = vld [vmem:[#allocation0] sm:$0x1] }
  0x8a   :  { %32 = vst [vmem:[%s56_s1] sm:$0x1] %v30_v8 }

// kernel: deepset_forward.1
= control target key start
LH: loop header
LB: loop body
LE: loop exit
PB: predicated region body
PF: predicated region fallthrough
CT: control target
= control target key end

     0   :  { %vm36_vm0 = vcmask 319488   ;;  %v529_v0 = vmov 0.0|0.0   ;;  %v530_v4 = vmov 0.0   ;;  %vm531_vm1 = vmmov 0   ;;  %s702_s1 = inlined_call_operand.vmem [shape: f32[128,40], index: 1, kind: input, shape index: {}]   ;;  %s703_s0 = inlined_call_operand.vmem [shape: f32[1,8,128], index: 0, kind: input, shape index: {}]   ;;  %s704_s3 = inlined_call_operand.vmem [shape: f32[40,16], index: 3, kind: input, shape index: {}]   ;;  %s705_s2 = inlined_call_operand.vmem [shape: f32[1,40], index: 2, kind: input, shape index: {}]   ;;  %s706_s5 = inlined_call_operand.vmem [shape: f32[16,10], index: 5, kind: input, shape index: {}]   ;;  %s707_s4 = inlined_call_operand.vmem [shape: f32[1,16], index: 4, kind: input, shape index: {}]   ;;  %s708_s7 = inlined_call_operand.vmem [shape: f32[10,128], index: 7, kind: input, shape index: {}]   ;;  %s709_s6 = inlined_call_operand.vmem [shape: f32[1,10], index: 6, kind: input, shape index: {}]   ;;  %s710_s8 = inlined_call_operand.vmem [shape: f32[1,128], index: 8, kind: input, shape index: {}]   ;;  %s711_s9 = inlined_call_operand.vmem [shape: f32[1,1,128], index: 9, kind: output, shape index: {}]  }
   0x1   :  { %488 = vmatprep.subr.bf16.mxu0 %v529_v0  ;;  %v39_v1 = vld [vmem:[%s702_s1] sm:$0xff]  ;;  %v40_v2 = vld [vmem:[%s702_s1 + $0x8] sm:$0xff]  ;;  %v41_v3 = vld [vmem:[%s702_s1 + $0x10] sm:$0xff]  ;;  %37 = vst.msk [vmem:[#allocation2] sm:$0x1] %vm36_vm0, %v530_v4  ;;  %458 = vmatprep.mubr.msk.f32.mxu0 %vm531_vm1, %v530_v4  ;;  %vm134_vm2 = vcmask 326656  }
   0x2   :  { %v489_v5 = vpack.c.bf16 %v40_v2, %v39_v1  ;;  %v42_v6 = vld [vmem:[%s702_s1 + $0x18] sm:$0xff]  ;;  %512 = vmatprep.subr.bf16.mxu1 %v529_v0  ;;  %471 = vmatprep.mubr.msk.f32.mxu1 %vm531_vm1, %v530_v4  ;;  %v43_v8 = vld [vmem:[%s702_s1 + $0x20] sm:$0xff]  ;;  %v44_v9 = vld [vmem:[%s702_s1 + $0x28] sm:$0xff]  ;;  %vm231_vm3 = vcmask 130048   ;;  %vm313_vm4 = vcmask 1041408   ;;  %vm532_vm5 = vmmov 1  }
   0x3   :  { %v492_v7 = vpack.c.bf16 %v42_v6, %v41_v3  ;;  %v495_v10 = vpack.c.bf16 %v44_v9, %v43_v8  ;;  %v45_v11 = vld [vmem:[%s702_s1 + $0x30] sm:$0xff]  ;;  %v46_v12 = vld [vmem:[%s702_s1 + $0x38] sm:$0xff]  ;;  %v47_v14 = vld [vmem:[%s702_s1 + $0x40] sm:$0xff]  ;;  %vm309_vm7 = vcmask 80896  }
   0x4   :  { %490 = vmatpush3.bf16.msra.mxu0 %v489_v5  ;;  %v498_v13 = vpack.c.bf16 %v46_v12, %v45_v11  ;;  %v48_v15 = vld [vmem:[%s702_s1 + $0x48] sm:$0xff]  ;;  %v49_v17 = vld [vmem:[%s702_s1 + $0x50] sm:$0xff]  ;;  %v50_v18 = vld [vmem:[%s702_s1 + $0x58] sm:$0xff] }
   0x5   :  { %491 = vmatprep.subr.bf16.mxu0 %v529_v0  ;;  %v501_v16 = vpack.c.bf16 %v48_v15, %v47_v14  ;;  %v504_v19 = vpack.c.bf16 %v50_v18, %v49_v17  ;;  %v51_v20 = vld [vmem:[%s702_s1 + $0x60] sm:$0xff]  ;;  %v52_v21 = vld [vmem:[%s702_s1 + $0x68] sm:$0xff]  ;;  %v53_v23 = vld [vmem:[%s702_s1 + $0x70] sm:$0xff] }
   0x6   :  { %v507_v22 = vpack.c.bf16 %v52_v21, %v51_v20  ;;  %v54_v24 = vld [vmem:[%s702_s1 + $0x78] sm:$0xff]  ;;  %v38_v26 = vld [vmem:[%s703_s0] sm:$0xff]  ;;  %v150_v28 = vld [vmem:[%s704_s3 + $0x8] sm:$0xff] }
   0x7   :  { %v510_v25 = vpack.c.bf16 %v54_v24, %v53_v23  ;;  %v149_v27 = vld [vmem:[%s704_s3] sm:$0xff]  ;;  %v151_v30 = vld [vmem:[%s704_s3 + $0x10] sm:$0xff]  ;;  %v152_v31 = vld [vmem:[%s704_s3 + $0x18] sm:$0xff] }
   0x8   :  { %493 = vmatpush3.bf16.msra.mxu0 %v492_v7  ;;  %v513_v29 = vpack.c.bf16 %v150_v28, %v149_v27  ;;  %v516_v32 = vpack.c.bf16 %v152_v31, %v151_v30  ;;  %v153_v33 = vld [vmem:[%s704_s3 + $0x20] sm:$0xff]  ;;  %v229_v49 = vld [vmem:[%s706_s5 + $0x8] sm:$0xff]  ;;  %vm523_vm6 = vmpackc.low %vm313_vm4, %vm532_vm5 }
   0x9   :  { %494 = vmatprep.subr.bf16.mxu0 %v529_v0  ;;  %v392_v34 = vld [vmem:[%s705_s2] ss:$0 sm:$0xff]  ;;  %v307_v57 = vld [vmem:[%s708_s7 + $0x8] sm:$0x3] }
   0xa   :  { %514 = vmatpush3.bf16.msra.mxu1 %v513_v29  ;;  %v133_v45 = vld [vmem:[#allocation2] sm:$0x1] }
   0xb   :  { %515 = vmatprep.subr.bf16.mxu1 %v529_v0  ;;  %v228_v48 = vld [vmem:[%s706_s5] sm:$0xff] }
   0xc   :  { %496 = vmatpush3.bf16.msra.mxu0 %v495_v10  ;;  %v519_v50 = vpack.c.bf16 %v229_v49, %v228_v48  ;;  %v154_v52 = vld [vmem:[%s707_s4] sm:$0x1] }
   0xd   :  { %497 = vmatprep.subr.bf16.mxu0 %v529_v0  ;;  %v306_v56 = vld [vmem:[%s708_s7] sm:$0xff] }
   0xe   :  { %517 = vmatpush3.bf16.msra.mxu1 %v516_v32  ;;  %v522_v58 = vpack.c.bf16 %v307_v57, %v306_v56  ;;  %v230_v59 = vld [vmem:[%s709_s6] sm:$0x1] }
   0xf   :  { %469 = vmatprep.subr.mxu1 %v530_v4 }
  0x10   :  { %499 = vmatpush3.bf16.msra.mxu0 %v498_v13 }
  0x11   :  { %500 = vmatprep.subr.bf16.mxu0 %v529_v0 }
  0x12   :  { %470 = vmatpush3.msra.mxu1 %v153_v33 }
  0x13   :  { %518 = vmatprep.subr.bf16.mxu1 %v529_v0 }
  0x14   :  { %502 = vmatpush3.bf16.msra.mxu0 %v501_v16 }
  0x15   :  { %503 = vmatprep.subr.bf16.mxu0 %v529_v0 }
  0x18   :  { %505 = vmatpush3.bf16.msra.mxu0 %v504_v19 }
  0x19   :  { %506 = vmatprep.subr.bf16.mxu0 %v529_v0 }
  0x1c   :  { %508 = vmatpush3.bf16.msra.mxu0 %v507_v22 }
  0x1d   :  { %509 = vmatprep.subr.bf16.mxu0 %v529_v0 }
  0x20   :  { %511 = vmatpush3.bf16.msra.mxu0 %v510_v25 }
  0x23   :  { %459 = vmatmul.mubr.f32.vlgmr.msra.gmra.mrb[0].mxu0 %v38_v26 }
  0xf6   :  { %v128_v35 = vpop.f32.mrb[0].mxu0 }
  0xf7   :  { %v129_v36 = vadd.f32 %v392_v34, %v128_v35  ;;  %v460_v37 = vpop.f32.mrb[1].mxu0 }
  0xf9   :  { %v132_v38 = vmax.f32 %v129_v36, 0.0 }
  0xfb   :  { %v135_v39 = vsel %vm134_vm2, %v132_v38, 0.0 }
  0xfc   :  { %v136_v40 = vrot.slane %v135_v39, 4 }
  0xfe   :  { %v137_v41 = vadd.f32 %v136_v40, %v135_v39 }
 0x100   :  { %v138_v42 = vrot.slane %v137_v41, 2 }
 0x102   :  { %v139_v43 = vadd.f32 %v138_v42, %v137_v41 }
 0x104   :  { %v140_v44 = vrot.slane %v139_v43, 1 }
 0x106   :  { %v141_v46 = vadd.f32 %v140_v44, %v139_v43 }
 0x108   :  { %v142_v47 = vadd.f32 %v141_v46, %v133_v45 }
 0x10a   :  { %144 = vst.msk [vmem:[#allocation2] sm:$0x1] %vm36_vm0, %v142_v47 }
 0x111   :  { %v148_v51 = vld [vmem:[#allocation2] sm:$0x1] }
 0x112   :  { %472 = vmatmul.mubr.msk.f32.vlgmr.msra.gmra.mrb[0].mxu1 %vm134_vm2, %v148_v51 }
 0x113   :  { %520 = vmatpush3.bf16.msra.mxu1 %v519_v50  ;;  %478 = vmatprep.mubr.msk.f32.mxu1 %vm531_vm1, %v530_v4 }
 0x114   :  { %521 = vmatprep.subr.bf16.mxu1 %v529_v0  ;;  %v308_v0 = vld [vmem:[%s710_s8] sm:$0x1] }
 0x1e5   :  { %v224_v53 = vpop.f32.mrb[0].mxu1 }
 0x1e6   :  { %v225_v54 = vadd.f32 %v224_v53, %v154_v52  ;;  %v473_v55 = vpop.f32.mrb[1].mxu1 }
 0x1e8   :  { %479 = vmatmul.mubr.msk.f32.vlgmr.msra.gmra.mrb[2].mxu1 %vm231_vm3, %v225_v54 }
 0x1e9   :  { %485 = vmatprep.mubr.msk.f32.mxu1 %vm531_vm1, %v530_v4  ;;  %524 = vmatpush3.bf16.msk.msra.mxu1 %vm523_vm6, %v522_v58 }
 0x2bb   :  { %v301_v60 = vpop.f32.mrb[2].mxu1 }
 0x2bc   :  { %v302_v61 = vadd.f32 %v301_v60, %v230_v59  ;;  %v480_v62 = vpop.f32.mrb[3].mxu1 }
 0x2be   :  { %v305_v63 = vmax.f32 %v302_v61, 0.0 }
 0x2c0   :  { %486 = vmatmul.mubr.msk.f32.vlgmr.msra.gmra.mrb[4].mxu1 %vm309_vm7, %v305_v63 }
 0x393   :  { %v383_v1 = vpop.f32.mrb[4].mxu1 }
 0x394   :  { %v384_v2 = vadd.f32 %v383_v1, %v308_v0  ;;  %v487_v3 = vpop.f32.mrb[5].mxu1 }
 0x396   :  { %387 = vst [vmem:[%s711_s9] sm:$0x1] %v384_v2 }

</bundles_post_ra>
